<compile_context>
chip_gen: v6e
topology: v6e:2x2x1
jax: 0.10.0
libtpu: 0.0.40
codegen_flags: <defaults>
</compile_context>

<pallas_src>
import numpy as np
import jax
import jax.numpy as jnp
from jax.experimental import pallas as pl
from jax.experimental.pallas import tpu as pltpu

LEAKY_SLOPE = 0.2


def _round_up(x, m):
    return (x + m - 1) // m * m


# ----------------------------------------------------------------------------
# Pallas kernel 1: tiled im2col matmul with fused bias + LeakyReLU (conv hot path)
# ----------------------------------------------------------------------------
def _conv_mm_kernel(a_ref, b_ref, bias_ref, o_ref):
    # bf16 x bf16 -> f32 accumulation on the MXU; epilogue in f32.
    acc = jnp.dot(a_ref[...], b_ref[...], preferred_element_type=jnp.float32)
    acc = acc + bias_ref[...]                       # (1, OC) broadcasts over rows
    o_ref[...] = jnp.where(acc > 0, acc, LEAKY_SLOPE * acc).astype(o_ref.dtype)


def _vmem_budget(tile_m, K, N, out_itemsize):
    a = tile_m * K * 2            # bf16 A tile
    b = K * N * 2                 # bf16 full B
    o = tile_m * N * out_itemsize # out tile
    bias = N * 4
    need = 2 * (a + o) + 2 * b + bias            # double-buffered A/out, B conservative
    need = int(need * 1.25) + (2 << 20)          # headroom
    return max(min(need, 56 << 20), 8 << 20)     # stay below v7x 64 MiB physical


def conv_leaky_matmul(a, b, bias_row, out_dtype=jnp.bfloat16, tile_m_cap=512):
    """a: (M, K) bf16 patches, b: (K, OC) bf16 weight, bias_row: (1, OC) f32 -> (M, OC)."""
    M, K = a.shape
    Kb, N = b.shape
    assert K == Kb
    tile_m = min(tile_m_cap, _round_up(M, 16))   # 16: bf16 sublane packing friendly
    grid = (pl.cdiv(M, tile_m),)
    return pl.pallas_call(
        _conv_mm_kernel,
        out_shape=jax.ShapeDtypeStruct((M, N), out_dtype),
        grid=grid,
        in_specs=[
            pl.BlockSpec((tile_m, K), lambda i: (i, 0)),   # A tile, pipelined over M
            pl.BlockSpec((K, N), lambda i: (0, 0)),        # full B, grid-invariant
            pl.BlockSpec((1, N), lambda i: (0, 0)),        # bias row
        ],
        out_specs=pl.BlockSpec((tile_m, N), lambda i: (i, 0)),
        compiler_params=pltpu.CompilerParams(
            dimension_semantics=("parallel",),
            vmem_limit_bytes=int(_vmem_budget(tile_m, K, N, jnp.dtype(out_dtype).itemsize)),
        ),
    )(a, b, bias_row)


# ----------------------------------------------------------------------------
# Pallas kernel 2: hinge / SAN loss head (all reductions in f32)
# ----------------------------------------------------------------------------
def _make_loss_kernel(model_type, loss_type, n):
    def kernel(h_ref, w_ref, o_ref):
        h = h_ref[...].astype(jnp.float32)           # (N, D)
        w = w_ref[...].astype(jnp.float32)           # (N, D)
        if model_type == "san":
            # F.normalize(w, dim=1): w / max(||w||, 1e-12) == w * rsqrt(max(||w||^2, 1e-24))
            sq = jnp.sum(w * w, axis=1, keepdims=True)
            w = w * jax.lax.rsqrt(jnp.maximum(sq, 1e-24))
        s = jnp.sum(h * w, axis=1, keepdims=True)    # (N, 1) logits
        if model_type == "gan":
            if loss_type == "G":
                loss = -jnp.sum(s, axis=0, keepdims=True) / n
            elif loss_type == "D_real":
                loss = jnp.sum(jnp.maximum(1.0 - s, 0.0), axis=0, keepdims=True) / n
            else:  # D_fake
                loss = jnp.sum(jnp.maximum(1.0 + s, 0.0), axis=0, keepdims=True) / n
        else:  # san  (.detach() only affects gradients; forward values identical)
            if loss_type == "G":
                loss = -jnp.sum(s, axis=0, keepdims=True) / n
            elif loss_type == "D_real":
                loss_h = jnp.sum(jnp.maximum(1.0 - s, 0.0), axis=0, keepdims=True) / n
                loss_w = -jnp.sum(s, axis=0, keepdims=True) / n
                loss = (loss_h + loss_w) * 0.5
            else:  # D_fake
                loss_h = jnp.sum(jnp.maximum(1.0 + s, 0.0), axis=0, keepdims=True) / n
                loss_w = jnp.sum(s, axis=0, keepdims=True) / n
                loss = (loss_h + loss_w) * 0.5
        o_ref[...] = loss
    return kernel


def head_loss(h, weights, model_type, loss_type):
    n = h.shape[0]
    out = pl.pallas_call(
        _make_loss_kernel(model_type, loss_type, n),
        out_shape=jax.ShapeDtypeStruct((1, 1), jnp.float32),
        in_specs=[pl.BlockSpec(memory_space=pltpu.MemorySpace.VMEM)] * 2,
        out_specs=pl.BlockSpec(memory_space=pltpu.MemorySpace.VMEM),
    )(h, weights)
    return out[0, 0]


# ----------------------------------------------------------------------------
# Glue: NHWC im2col (layout transform), conv wrapper, spectral norm (param setup)
# ----------------------------------------------------------------------------
def _im2col_nhwc(x, k, stride, padding):
    """x: (N, H, W, C) -> (N*OH*OW, k*k*C), column order (kh, kw, C)."""
    if padding > 0:
        x = jnp.pad(x, ((0, 0), (padding, padding), (padding, padding), (0, 0)))
    N, H, W, C = x.shape
    OH = (H - k) // stride + 1
    OW = (W - k) // stride + 1
    cols = []
    for ki in range(k):
        for kj in range(k):
            cols.append(x[:, ki:ki + stride * OH:stride, kj:kj + stride * OW:stride, :])
    p = jnp.stack(cols, axis=3)                      # (N, OH, OW, k*k, C)
    p = p.reshape(N * OH * OW, k * k * C)
    return p, N, OH, OW


def conv2d_leaky_nhwc(x, w_mat, bias_row, k, stride, padding):
    """x: (N, H, W, C) bf16; w_mat: (k*k*IC, OC) bf16 -> (N, OH, OW, OC) bf16."""
    patches, N, OH, OW = _im2col_nhwc(x, k, stride, padding)
    out = conv_leaky_matmul(patches, w_mat, bias_row)    # (N*OH*OW, OC)
    return out.reshape(N, OH, OW, -1)


def spectral_normalize(w, n_iter=20):
    oc = w.shape[0]
    w_mat = w.reshape(oc, -1)
    u = jnp.full((oc,), 1.0 / np.sqrt(oc), dtype=w.dtype)
    v = None
    for _ in range(n_iter):
        v = w_mat.T @ u
        v = v / jnp.maximum(jnp.linalg.norm(v), 1e-12)
        u = w_mat @ v
        u = u / jnp.maximum(jnp.linalg.norm(u), 1e-12)
    sigma = u @ (w_mat @ v)
    return w / sigma


def _to_matmul_weight(w):
    """(OC, IC, kh, kw) f32 -> (kh*kw*IC, OC) bf16, matching NHWC im2col column order."""
    OC, IC, kh, kw = w.shape
    return w.transpose(2, 3, 1, 0).reshape(kh * kw * IC, OC).astype(jnp.bfloat16)


# ----------------------------------------------------------------------------
# Module
# ----------------------------------------------------------------------------
class Discriminator:
    def __init__(self, num_class=10, model_type="san", key=jax.random.PRNGKey(42)):
        self.model_type = model_type
        self.layers = [128, 256, 512]
        self.use_class = num_class > 0
        ks = jax.random.split(key, 4)

        def conv_init(kk, oc, ic, ksize):
            fan_in = ic * ksize * ksize
            return jax.random.normal(kk, (oc, ic, ksize, ksize), jnp.float32) / np.sqrt(fan_in)

        # conv0: 1->128, k=6, s=2, p=0, norm=none
        self.w0 = conv_init(ks[0], self.layers[0], 1, 6)
        self.b0 = jnp.zeros((self.layers[0],), jnp.float32)
        # conv1: 128->256, k=4, s=2, p=1, spectral norm (param preprocessing)
        self.w1 = spectral_normalize(conv_init(ks[1], self.layers[1], self.layers[0], 4))
        self.b1 = jnp.zeros((self.layers[1],), jnp.float32)
        # conv2: 256->512, k=4, s=2, p=1, spectral norm
        self.w2 = spectral_normalize(conv_init(ks[2], self.layers[2], self.layers[1], 4))
        self.b2 = jnp.zeros((self.layers[2],), jnp.float32)

        nc = num_class if self.use_class else 1
        # fc_w stored in PyTorch (C, H, W) flatten order (reference semantics);
        # fc_w_nhwc is the one-time column permutation for the NHWC kernel path.
        self.fc_w = jax.random.normal(ks[3], (nc, self.layers[2] * 3 * 3), jnp.float32)
        self.fc_w_nhwc = (self.fc_w.reshape(nc, self.layers[2], 3, 3)
                          .transpose(0, 2, 3, 1).reshape(nc, -1))

        # Precomputed bf16 matmul weights + f32 bias rows (one-time).
        self.w0_mat, self.b0_row = _to_matmul_weight(self.w0), self.b0.reshape(1, -1)
        self.w1_mat, self.b1_row = _to_matmul_weight(self.w1), self.b1.reshape(1, -1)
        self.w2_mat, self.b2_row = _to_matmul_weight(self.w2), self.b2.reshape(1, -1)

    def __call__(self, x, class_ids, loss_type):
        assert loss_type in ("G", "D_real", "D_fake")
        # NCHW module boundary -> NHWC bf16 once (channels on the lane dim thereafter).
        x = jnp.transpose(x, (0, 2, 3, 1)).astype(jnp.bfloat16)
        x = conv2d_leaky_nhwc(x, self.w0_mat, self.b0_row, k=6, stride=2, padding=0)  # (N,12,12,128)
        x = conv2d_leaky_nhwc(x, self.w1_mat, self.b1_row, k=4, stride=2, padding=1)  # (N,6,6,256)
        x = conv2d_leaky_nhwc(x, self.w2_mat, self.b2_row, k=4, stride=2, padding=1)  # (N,3,3,512)
        h = x.reshape(x.shape[0], -1)                                                 # (N, 4608) NHWC order
        idx = class_ids if self.use_class else jnp.zeros((h.shape[0],), jnp.int32)
        weights = self.fc_w_nhwc[idx]                 # (N, D) gather; fc_w itself stays tiny
        return head_loss(h, weights, self.model_type, loss_type)


# ----------------------------------------------------------------------------
# Pure-JAX f32 reference (NCHW) for a silent sanity check
# ----------------------------------------------------------------------------
def reference_forward(m, x, class_ids, loss_type):
    def conv(x, w, b, stride, pad):
        y = jax.lax.conv_general_dilated(
            x, w, (stride, stride), [(pad, pad), (pad, pad)],
            dimension_numbers=("NCHW", "OIHW", "NCHW"))
        y = y + b[None, :, None, None]
        return jnp.where(y > 0, y, LEAKY_SLOPE * y)

    x = conv(x, m.w0, m.b0, 2, 0)
    x = conv(x, m.w1, m.b1, 2, 1)
    x = conv(x, m.w2, m.b2, 2, 1)
    h = x.reshape(x.shape[0], -1)
    w = m.fc_w[class_ids]
    wn = w / jnp.maximum(jnp.linalg.norm(w, axis=1, keepdims=True), 1e-12)
    s = jnp.sum(h * wn, axis=1)
    if loss_type == "G":
        return -s.mean()
    if loss_type == "D_real":
        return (jnp.maximum(1.0 - s, 0.0).mean() - s.mean()) / 2.0
    return (jnp.maximum(1.0 + s, 0.0).mean() + s.mean()) / 2.0


if __name__ == "__main__":
    key = jax.random.PRNGKey(0)
    kx, kc = jax.random.split(key)
    # MNIST-like input implied by fc_w = 512*3*3 (28 -> 12 -> 6 -> 3)
    x = jax.random.normal(kx, (2, 1, 28, 28), jnp.float32)
    class_ids = jax.random.randint(kc, (2,), 0, 10)

    model = Discriminator(num_class=10, model_type="san")

    for lt in ("G", "D_real", "D_fake"):
        out = model(x, class_ids, lt)
        out = jax.block_until_ready(out)
        ref = reference_forward(model, x, class_ids, lt)
        # bf16 MXU operands vs f32 reference -> loose tolerance.
        np.testing.assert_allclose(np.asarray(out), np.asarray(ref), rtol=5e-2, atol=5e-2)

    print("KERNEL_OK")
</pallas_src>

<mosaic_0001>
module attributes {stable_mosaic.version = 11 : i64} {
  func.func @_conv_mm_kernel(%arg0: i32, %arg1: memref<288x36xbf16, #tpu.memory_space<vmem>>, %arg2: memref<36x128xbf16, #tpu.memory_space<vmem>>, %arg3: memref<1x128xf32, #tpu.memory_space<vmem>>, %arg4: memref<288x128xbf16, #tpu.memory_space<vmem>>) attributes {dimension_semantics = [#tpu.dimension_semantics<parallel>], iteration_bounds = array<i64: 1>, scalar_prefetch = 0 : i64, scratch_operands = 0 : i64, tpu.core_type = #tpu.core_type<tc>, window_params = [{transform_indices = @transform_0, window_bounds = array<i64: 288, 36>}, {pipeline_mode = #tpu.pipeline_mode<synchronous>, transform_indices = @transform_1, window_bounds = array<i64: 36, 128>}, {pipeline_mode = #tpu.pipeline_mode<synchronous>, transform_indices = @transform_2, window_bounds = array<i64: 1, 128>}, {transform_indices = @transform_3, window_bounds = array<i64: 288, 128>}]} {
    %c0 = arith.constant 0 : index
    %c0_0 = arith.constant 0 : index
    %0 = vector.load %arg1[%c0, %c0_0] : memref<288x36xbf16, #tpu.memory_space<vmem>>, vector<288x36xbf16>
    %c0_1 = arith.constant 0 : index
    %c0_2 = arith.constant 0 : index
    %1 = vector.load %arg2[%c0_1, %c0_2] : memref<36x128xbf16, #tpu.memory_space<vmem>>, vector<36x128xbf16>
    %cst = arith.constant dense<0.000000e+00> : vector<288x128xf32>
    %2 = tpu.matmul %0, %1, %cst {dimension_numbers = #tpu.dot_dimension_numbers<[1], [0], [0], [1], [0, 0, 1, 1], [], []>} : vector<288x36xbf16>, vector<36x128xbf16>, vector<288x128xf32> -> vector<288x128xf32>
    %c0_3 = arith.constant 0 : index
    %c0_4 = arith.constant 0 : index
    %3 = vector.load %arg3[%c0_3, %c0_4] : memref<1x128xf32, #tpu.memory_space<vmem>>, vector<1x128xf32>
    %4 = vector.broadcast %3 : vector<1x128xf32> to vector<288x128xf32>
    %5 = arith.addf %2, %4 : vector<288x128xf32>
    %cst_5 = arith.constant 0.000000e+00 : f32
    %6 = vector.broadcast %cst_5 : f32 to vector<288x128xf32>
    %7 = arith.cmpf ogt, %5, %6 : vector<288x128xf32>
    %cst_6 = arith.constant 2.000000e-01 : f32
    %8 = vector.broadcast %cst_6 : f32 to vector<288x128xf32>
    %9 = arith.mulf %8, %5 : vector<288x128xf32>
    %10 = arith.select %7, %5, %9 : vector<288x128xi1>, vector<288x128xf32>
    %11 = arith.truncf %10 : vector<288x128xf32> to vector<288x128xbf16>
    %c0_7 = arith.constant 0 : index
    %c0_8 = arith.constant 0 : index
    %12 = vector.load %arg4[%c0_7, %c0_8] : memref<288x128xbf16, #tpu.memory_space<vmem>>, vector<288x128xbf16>
    tpu.vector_store %arg4[%c0_7, %c0_8], %11 {strides = array<i32>} : memref<288x128xbf16, #tpu.memory_space<vmem>>, vector<288x128xbf16>,
    return
  }
  func.func @transform_0(%arg0: i32) -> (i32, i32) {
    %c0_i32 = arith.constant 0 : i32
    %c0_i32_0 = arith.constant 0 : i32
    return %arg0, %c0_i32 : i32, i32
  }
  func.func @transform_1(%arg0: i32) -> (i32, i32) {
    %c0_i32 = arith.constant 0 : i32
    %c0_i32_0 = arith.constant 0 : i32
    %c0_i32_1 = arith.constant 0 : i32
    return %c0_i32, %c0_i32_0 : i32, i32
  }
  func.func @transform_2(%arg0: i32) -> (i32, i32) {
    %c0_i32 = arith.constant 0 : i32
    %c0_i32_0 = arith.constant 0 : i32
    %c0_i32_1 = arith.constant 0 : i32
    return %c0_i32, %c0_i32_0 : i32, i32
  }
  func.func @transform_3(%arg0: i32) -> (i32, i32) {
    %c0_i32 = arith.constant 0 : i32
    %c0_i32_0 = arith.constant 0 : i32
    return %arg0, %c0_i32 : i32, i32
  }
}

</mosaic_0001>

<bundles_post_ra>
// kernel: tpu_custom_call.1
= control target key start
LH: loop header
LB: loop body
LE: loop exit
PB: predicated region body
PF: predicated region fallthrough
CT: control target
= control target key end

     0   :  { %vm224_vm0 = vcmask 1041408   ;;  %vm169_vm1 = vcmask 293888   ;;  %s1198_s0 = inlined_call_operand.vmem [shape: bf16[288,36], index: 0, kind: input, shape index: {}]   ;;  %s1199_s1 = inlined_call_operand.vmem [shape: bf16[36,128], index: 1, kind: input, shape index: {}]   ;;  %s1200_s2 = inlined_call_operand.vmem [shape: f32[1,128], index: 2, kind: input, shape index: {}]   ;;  %s1201_s3 = inlined_call_operand.hbm [shape: bf16[288,128], index: 3, kind: output, shape index: {}]  }
   0x1   :  { %v1002_v0 = vld [vmem:[%s1199_s1 + $0x10] ss:$0 sps:$4 sm:$0x33]   ;;  %v1003_v1 = vld [vmem:[%s1199_s1 + $0x8] sm:$0xff]   ;;  %v1004_v3 = vld [vmem:[%s1199_s1] sm:$0xff]  }
   0x2   :  { %997 = vmatprep.subr.msk.bf16.mxu0 %vm224_vm0, %v1002_v0  ;;  %998 = vmatprep.subr.msk.bf16.mxu1 %vm224_vm0, %v1002_v0  ;;  %v226_v2 = vsel %vm224_vm0, %v1002_v0, 0  ;;  %v1005_v4 = vld [vmem:[%s1198_s0] sm:$0xff]   ;;  %v1006_v5 = vld [vmem:[%s1198_s0 + $0x50] sm:$0xff]   ;;  %v1007_v6 = vld [vmem:[%s1198_s0 + $0x8] sm:$0xff]  }
   0x3   :  { %950 = vmatpush3.bf16.msra.mxu0 %v226_v2  ;;  %994 = vmatpush3.bf16.msra.mxu1 %v226_v2  ;;  %v1008_v7 = vld [vmem:[%s1198_s0 + $0x58] sm:$0xff]   ;;  %v1009_v8 = vld [vmem:[%s1198_s0 + $0x10] sm:$0xff]   ;;  %v1010_v9 = vld [vmem:[%s1198_s0 + $0x60] sm:$0xff]  }
   0x4   :  { %951 = vmatprep.subr.bf16.mxu0 %v1003_v1  ;;  %992 = vmatprep.subr.bf16.mxu1 %v1003_v1  ;;  %v1011_v10 = vld [vmem:[%s1198_s0 + $0x18] sm:$0xff]   ;;  %v1012_v11 = vld [vmem:[%s1198_s0 + $0x68] sm:$0xff]   ;;  %v1013_v12 = vld [vmem:[%s1198_s0 + $0x20] sm:$0xff]  }
   0x5   :  { %955 = vmatprep.mubr.msk.bf16.mxu0 %vm169_vm1, %v1005_v4  ;;  %975 = vmatprep.mubr.msk.bf16.mxu1 %vm169_vm1, %v1006_v5  ;;  %v1014_v13 = vld [vmem:[%s1198_s0 + $0x70] sm:$0xff]  }
   0x7   :  { %952 = vmatpush3.bf16.msra.mxu0 %v1003_v1  ;;  %995 = vmatpush3.bf16.msra.mxu1 %v1003_v1 }
   0x8   :  { %953 = vmatprep.subr.bf16.mxu0 %v1004_v3  ;;  %993 = vmatprep.subr.bf16.mxu1 %v1004_v3 }
   0xb   :  { %954 = vmatpush3.bf16.msra.mxu0 %v1004_v3  ;;  %996 = vmatpush3.bf16.msra.mxu1 %v1004_v3 }
   0xe   :  { %956 = vmatmul.mubr.msk.bf16.vlgmr.msra.gmra.mxu0 %vm169_vm1, %v1007_v6  ;;  %976 = vmatmul.mubr.msk.bf16.vlgmr.msra.gmra.mxu1 %vm169_vm1, %v1008_v7 }
   0xf   :  { %959 = vmatprep.mubr.msk.bf16.mxu0 %vm169_vm1, %v1009_v8  ;;  %979 = vmatprep.mubr.msk.bf16.mxu1 %vm169_vm1, %v1010_v9 }
  0x10   :  { %8 = vsyncpa [#allocation3], 0  ;;  %v1015_v14 = vld [vmem:[%s1198_s0 + $0x28] sm:$0xff]   ;;  %v1016_v15 = vld [vmem:[%s1198_s0 + $0x78] sm:$0xff]  }
  0x11   :  { %v1017_v16 = vld [vmem:[%s1198_s0 + $0x30] sm:$0xff]   ;;  %v1018_v17 = vld [vmem:[%s1198_s0 + $0x80] sm:$0xff]   ;;  %v1019_v18 = vld [vmem:[%s1198_s0 + $0x38] sm:$0xff]  }
  0x12   :  { %v1020_v19 = vld [vmem:[%s1198_s0 + $0x88] sm:$0xff]   ;;  %v1021_v20 = vld [vmem:[%s1198_s0 + $0x40] sm:$0xff]  }
  0x13   :  { %v1022_v21 = vld [vmem:[%s1198_s0 + $0x48] sm:$0xff]   ;;  %v1152_v22 = vld [vmem:[%s1200_s2] ss:$0 sm:$0xff]  ;;  %s1045_s0 = smov [#allocation2]  }
  0x14   :  { %s698_s2 = sshll.u32 %s1045_s0, 4  ;;  %s699_s2 = int_to_ptr.vmem [resolvable:$true] %s698_s2 }
  0x15   :  { %s1023_s27 = scalar_lea.vmem %s699_s2, 2304  ;;  %p1028_p1 = scmp.lt.s32.totalorder %s699_s2, %s699_s2 }
  0x16   :  { %960 = vmatmul.mubr.msk.bf16.gmra.mxu0 %vm169_vm1, %v1011_v10  ;;  %980 = vmatmul.mubr.msk.bf16.gmra.mxu1 %vm169_vm1, %v1012_v11  ;;  %p1024_p0 = scmp.ne.s32.totalorder %s699_s2, %s1023_s27  ;;  %p1029_p2 = scmp.lt.s32.totalorder %s1023_s27, %s1023_s27 }
  0x17   :  { %963 = vmatprep.mubr.msk.bf16.mxu0 %vm169_vm1, %v1013_v12  ;;  %983 = vmatprep.mubr.msk.bf16.mxu1 %vm169_vm1, %v1014_v13 }
  0x18   :  { %p1030_p3 = por %p1029_p2, %p1028_p1 }
  0x1a   :  { %p1031_p4 = pnand %p1030_p3, %p1024_p0 }
  0x1e   :  { %964 = vmatmul.mubr.msk.bf16.gmra.mxu0 %vm169_vm1, %v1015_v14  ;;  %984 = vmatmul.mubr.msk.bf16.gmra.mxu1 %vm169_vm1, %v1016_v15 }
  0x1f   :  { %967 = vmatprep.mubr.msk.bf16.mxu0 %vm169_vm1, %v1017_v16  ;;  %987 = vmatprep.mubr.msk.bf16.mxu1 %vm169_vm1, %v1018_v17 }
  0x26   :  { %968 = vmatmul.mubr.msk.bf16.gmra.mxu0 %vm169_vm1, %v1019_v18  ;;  %988 = vmatmul.mubr.msk.bf16.gmra.mxu1 %vm169_vm1, %v1020_v19 }
  0x27   :  { %971 = vmatprep.mubr.msk.bf16.mxu0 %vm169_vm1, %v1021_v20 }
  0x2e   :  { %972 = vmatmul.mubr.msk.bf16.gmra.mxu0 %vm169_vm1, %v1022_v21 }
  0xce   :  { %v957_v23 = vpop.f32.mrf.mxu0  ;;  %v977_v24 = vpop.f32.mrf.mxu1 }
  0xcf   :  { %v271_v25 = vadd.f32 %v957_v23, %v1152_v22  ;;  %v351_v26 = vadd.f32 %v977_v24, %v1152_v22 }
  0xd0   :  { %v262_v27 = vpop.f32.mrf.mxu0  ;;  %v342_v28 = vpop.f32.mrf.mxu1 }
  0xd1   :  { %vm407_vm2 = vcmp.gt.f32.partialorder %v271_v25, 0.0  ;;  %v443_v29 = vmul.f32 0.2, %v271_v25  ;;  %vm427_vm3 = vcmp.gt.f32.partialorder %v351_v26, 0.0  ;;  %v463_v30 = vmul.f32 0.2, %v351_v26 }
  0xd2   :  { %v263_v31 = vadd.f32 %v1152_v22, %v262_v27  ;;  %v343_v32 = vadd.f32 %v1152_v22, %v342_v28  ;;  %v958_v33 = vpop.f32.mrf.mxu0  ;;  %v978_v34 = vpop.f32.mrf.mxu1 }
  0xd3   :  { %v479_v35 = vsel %vm407_vm2, %v271_v25, %v443_v29  ;;  %v274_v36 = vadd.f32 %v958_v33, %v1152_v22  ;;  %v354_v37 = vadd.f32 %v978_v34, %v1152_v22  ;;  %v499_v38 = vsel %vm427_vm3, %v351_v26, %v463_v30 }
  0xd4   :  { %vm405_vm4 = vcmp.gt.f32.partialorder %v263_v31, 0.0  ;;  %vm425_vm5 = vcmp.gt.f32.partialorder %v343_v32, 0.0  ;;  %v461_v39 = vmul.f32 0.2, %v343_v32  ;;  %v265_v40 = vpop.f32.mrf.mxu0  ;;  %v345_v41 = vpop.f32.mrf.mxu1  ;;  %v441_v44 = vmul.f32 0.2, %v263_v31 }
  0xd5   :  { %vm408_vm6 = vcmp.gt.f32.partialorder %v274_v36, 0.0  ;;  %v444_v42 = vmul.f32 0.2, %v274_v36  ;;  %vm428_vm7 = vcmp.gt.f32.partialorder %v354_v37, 0.0  ;;  %v464_v43 = vmul.f32 0.2, %v354_v37 }
  0xd6   :  { %v497_v45 = vsel %vm425_vm5, %v343_v32, %v461_v39  ;;  %v266_v46 = vadd.f32 %v1152_v22, %v265_v40  ;;  %v346_v47 = vadd.f32 %v1152_v22, %v345_v41  ;;  %v961_v48 = vpop.f32.mrf.mxu0  ;;  %v981_v49 = vpop.f32.mrf.mxu1  ;;  %v477_v61 = vsel %vm405_vm4, %v263_v31, %v441_v44 }
  0xd7   :  { %v480_v50 = vsel %vm408_vm6, %v274_v36, %v444_v42  ;;  %v500_v51 = vsel %vm428_vm7, %v354_v37, %v464_v43  ;;  %v287_v52 = vadd.f32 %v961_v48, %v1152_v22  ;;  %v367_v53 = vadd.f32 %v981_v49, %v1152_v22 }
  0xd8   :  { %v829_v54 = vpack.c.bf16 %v480_v50, %v479_v35  ;;  %v879_v55 = vpack.c.bf16 %v500_v51, %v499_v38  ;;  %vm406_vm8 = vcmp.gt.f32.partialorder %v266_v46, 0.0  ;;  %v442_v56 = vmul.f32 0.2, %v266_v46  ;;  %v278_v57 = vpop.f32.mrf.mxu0  ;;  %v358_v58 = vpop.f32.mrf.mxu1 }
  0xd9   :  { %vm426_vm9 = vcmp.gt.f32.partialorder %v346_v47, 0.0  ;;  %v462_v59 = vmul.f32 0.2, %v346_v47  ;;  %vm411_vm10 = vcmp.gt.f32.partialorder %v287_v52, 0.0  ;;  %v447_v60 = vmul.f32 0.2, %v287_v52 }
  0xda   :  { %911 = vst [vmem:[#allocation2 + $0x8] sm:$0xff] %v829_v54   ;;  %921 = vst [vmem:[#allocation2 + $0x58] sm:$0xff] %v879_v55   ;;  %v478_v62 = vsel %vm406_vm8, %v266_v46, %v442_v56  ;;  %v467_v63 = vmul.f32 0.2, %v367_v53  ;;  %v279_v0 = vadd.f32 %v1152_v22, %v278_v57  ;;  %v962_v1 = vpop.f32.mrf.mxu0  ;;  %v982_v2 = vpop.f32.mrf.mxu1  ;;  %vm431_vm11 = vcmp.gt.f32.partialorder %v367_v53, 0.0 }
  0xdb   :  { %v824_v3 = vpack.c.bf16 %v478_v62, %v477_v61  ;;  %v498_v4 = vsel %vm426_vm9, %v346_v47, %v462_v59  ;;  %v359_v5 = vadd.f32 %v1152_v22, %v358_v58  ;;  %v483_v7 = vsel %vm411_vm10, %v287_v52, %v447_v60 }
  0xdc   :  { %v874_v6 = vpack.c.bf16 %v498_v4, %v497_v45  ;;  %vm409_vm12 = vcmp.gt.f32.partialorder %v279_v0, 0.0  ;;  %v445_v8 = vmul.f32 0.2, %v279_v0  ;;  %v281_v9 = vpop.f32.mrf.mxu0  ;;  %v361_v10 = vpop.f32.mrf.mxu1  ;;  %v290_v12 = vadd.f32 %v962_v1, %v1152_v22 }
  0xdd   :  { %825 = vst [vmem:[#allocation2] sm:$0xff] %v824_v3   ;;  %vm429_vm13 = vcmp.gt.f32.partialorder %v359_v5, 0.0  ;;  %v465_v11 = vmul.f32 0.2, %v359_v5  ;;  %v370_v13 = vadd.f32 %v982_v2, %v1152_v22  ;;  %v503_v14 = vsel %vm431_vm11, %v367_v53, %v467_v63 }
  0xde   :  { %920 = vst [vmem:[#allocation2 + $0x50] sm:$0xff] %v874_v6   ;;  %v481_v15 = vsel %vm409_vm12, %v279_v0, %v445_v8  ;;  %v282_v16 = vadd.f32 %v1152_v22, %v281_v9  ;;  %v362_v17 = vadd.f32 %v1152_v22, %v361_v10  ;;  %v965_v18 = vpop.f32.mrf.mxu0  ;;  %v985_v19 = vpop.f32.mrf.mxu1  ;;  %vm412_vm14 = vcmp.gt.f32.partialorder %v290_v12, 0.0 }
  0xdf   :  { %v501_v20 = vsel %vm429_vm13, %v359_v5, %v465_v11  ;;  %v448_v21 = vmul.f32 0.2, %v290_v12  ;;  %vm432_vm15 = vcmp.gt.f32.partialorder %v370_v13, 0.0  ;;  %v468_v23 = vmul.f32 0.2, %v370_v13 }
  0xe0   :  { %vm410_vm0 = vcmp.gt.f32.partialorder %v282_v16, 0.0  ;;  %v446_v24 = vmul.f32 0.2, %v282_v16  ;;  %vm430_vm1 = vcmp.gt.f32.partialorder %v362_v17, 0.0  ;;  %v294_v25 = vpop.f32.mrf.mxu0  ;;  %v374_v26 = vpop.f32.mrf.mxu1  ;;  %v466_v28 = vmul.f32 0.2, %v362_v17 }
  0xe1   :  { %v484_v27 = vsel %vm412_vm14, %v290_v12, %v448_v21  ;;  %v303_v29 = vadd.f32 %v965_v18, %v1152_v22  ;;  %v383_v30 = vadd.f32 %v985_v19, %v1152_v22  ;;  %v504_v32 = vsel %vm432_vm15, %v370_v13, %v468_v23 }
  0xe2   :  { %v839_v31 = vpack.c.bf16 %v484_v27, %v483_v7  ;;  %v482_v33 = vsel %vm410_vm0, %v282_v16, %v446_v24  ;;  %v295_v34 = vadd.f32 %v1152_v22, %v294_v25  ;;  %v966_v35 = vpop.f32.mrf.mxu0  ;;  %v986_v36 = vpop.f32.mrf.mxu1  ;;  %v889_v37 = vpack.c.bf16 %v504_v32, %v503_v14 }
  0xe3   :  { %v834_v38 = vpack.c.bf16 %v482_v33, %v481_v15  ;;  %v502_v39 = vsel %vm430_vm1, %v362_v17, %v466_v28  ;;  %vm415_vm2 = vcmp.gt.f32.partialorder %v303_v29, 0.0  ;;  %v451_v41 = vmul.f32 0.2, %v303_v29 }
  0xe4   :  { %913 = vst [vmem:[#allocation2 + $0x18] sm:$0xff] %v839_v31   ;;  %v884_v40 = vpack.c.bf16 %v502_v39, %v501_v20  ;;  %vm435_vm3 = vcmp.gt.f32.partialorder %v383_v30, 0.0  ;;  %v471_v42 = vmul.f32 0.2, %v383_v30  ;;  %v297_v43 = vpop.f32.mrf.mxu0  ;;  %v377_v44 = vpop.f32.mrf.mxu1  ;;  %923 = vst [vmem:[#allocation2 + $0x68] sm:$0xff] %v889_v37   ;;  %vm413_vm4 = vcmp.gt.f32.partialorder %v295_v34, 0.0 }
  0xe5   :  { %912 = vst [vmem:[#allocation2 + $0x10] sm:$0xff] %v834_v38   ;;  %v449_v45 = vmul.f32 0.2, %v295_v34  ;;  %v375_v46 = vadd.f32 %v1152_v22, %v374_v26  ;;  %v306_v47 = vadd.f32 %v966_v35, %v1152_v22  ;;  %v487_v48 = vsel %vm415_vm2, %v303_v29, %v451_v41 }
  0xe6   :  { %922 = vst [vmem:[#allocation2 + $0x60] sm:$0xff] %v884_v40   ;;  %v386_v49 = vadd.f32 %v986_v36, %v1152_v22  ;;  %v298_v50 = vadd.f32 %v1152_v22, %v297_v43  ;;  %v969_v51 = vpop.f32.mrf.mxu0  ;;  %v989_v52 = vpop.f32.mrf.mxu1  ;;  %v507_v53 = vsel %vm435_vm3, %v383_v30, %v471_v42  ;;  %v378_v61 = vadd.f32 %v1152_v22, %v377_v44 }
  0xe7   :  { %v485_v54 = vsel %vm413_vm4, %v295_v34, %v449_v45  ;;  %v469_v55 = vmul.f32 0.2, %v375_v46  ;;  %vm416_vm5 = vcmp.gt.f32.partialorder %v306_v47, 0.0  ;;  %v452_v56 = vmul.f32 0.2, %v306_v47 }
  0xe8   :  { %vm436_vm6 = vcmp.gt.f32.partialorder %v386_v49, 0.0  ;;  %v472_v57 = vmul.f32 0.2, %v386_v49  ;;  %vm414_vm7 = vcmp.gt.f32.partialorder %v298_v50, 0.0  ;;  %v310_v58 = vpop.f32.mrf.mxu0  ;;  %v390_v59 = vpop.f32.mrf.mxu1  ;;  %vm433_vm8 = vcmp.gt.f32.partialorder %v375_v46, 0.0 }
  0xe9   :  { %v450_v60 = vmul.f32 0.2, %v298_v50  ;;  %v319_v62 = vadd.f32 %v969_v51, %v1152_v22  ;;  %v488_v63 = vsel %vm416_vm5, %v306_v47, %v452_v56  ;;  %v399_v1 = vadd.f32 %v989_v52, %v1152_v22 }
  0xea   :  { %v508_v0 = vsel %vm436_vm6, %v386_v49, %v472_v57  ;;  %v311_v2 = vadd.f32 %v1152_v22, %v310_v58  ;;  %v970_v3 = vpop.f32.mrf.mxu0  ;;  %v990_v4 = vpop.f32.mrf.mxu1  ;;  %v849_v5 = vpack.c.bf16 %v488_v63, %v487_v48  ;;  %vm434_vm9 = vcmp.gt.f32.partialorder %v378_v61, 0.0 }
  0xeb   :  { %v899_v6 = vpack.c.bf16 %v508_v0, %v507_v53  ;;  %v486_v7 = vsel %vm414_vm7, %v298_v50, %v450_v60  ;;  %v505_v8 = vsel %vm433_vm8, %v375_v46, %v469_v55  ;;  %v470_v10 = vmul.f32 0.2, %v378_v61 }
  0xec   :  { %v844_v9 = vpack.c.bf16 %v486_v7, %v485_v54  ;;  %v313_v11 = vpop.f32.mrf.mxu0  ;;  %915 = vst [vmem:[#allocation2 + $0x28] sm:$0xff] %v849_v5   ;;  %vm419_vm10 = vcmp.gt.f32.partialorder %v319_v62, 0.0  ;;  %v455_v12 = vmul.f32 0.2, %v319_v62  ;;  %vm439_vm11 = vcmp.gt.f32.partialorder %v399_v1, 0.0  ;;  %v393_v17 = vpop.f32.mrf.mxu1 }
  0xed   :  { %925 = vst [vmem:[#allocation2 + $0x78] sm:$0xff] %v899_v6   ;;  %v475_v13 = vmul.f32 0.2, %v399_v1  ;;  %v506_v14 = vsel %vm434_vm9, %v378_v61, %v470_v10  ;;  %vm417_vm12 = vcmp.gt.f32.partialorder %v311_v2, 0.0  ;;  %v391_v15 = vadd.f32 %v1152_v22, %v390_v59 }
  0xee   :  { %914 = vst [vmem:[#allocation2 + $0x20] sm:$0xff] %v844_v9   ;;  %v322_v16 = vadd.f32 %v970_v3, %v1152_v22  ;;  %v973_v18 = vpop.f32.mrf.mxu0  ;;  %v894_v19 = vpack.c.bf16 %v506_v14, %v505_v8  ;;  %v453_v21 = vmul.f32 0.2, %v311_v2  ;;  %v402_v23 = vadd.f32 %v990_v4, %v1152_v22 }
  0xef   :  { %v511_v20 = vsel %vm439_vm11, %v399_v1, %v475_v13  ;;  %vm437_vm13 = vcmp.gt.f32.partialorder %v391_v15, 0.0  ;;  %v473_v24 = vmul.f32 0.2, %v391_v15  ;;  %v314_v28 = vadd.f32 %v1152_v22, %v313_v11 }
  0xf0   :  { %vm420_vm14 = vcmp.gt.f32.partialorder %v322_v16, 0.0  ;;  %v456_v25 = vmul.f32 0.2, %v322_v16  ;;  %v326_v26 = vpop.f32.mrf.mxu0  ;;  %924 = vst [vmem:[#allocation2 + $0x70] sm:$0xff] %v894_v19   ;;  %vm440_vm15 = vcmp.gt.f32.partialorder %v402_v23, 0.0  ;;  %v394_v29 = vadd.f32 %v1152_v22, %v393_v17 }
  0xf1   :  { %v476_v27 = vmul.f32 0.2, %v402_v23  ;;  %v491_v30 = vsel %vm419_vm10, %v319_v62, %v455_v12  ;;  %v335_v32 = vadd.f32 %v973_v18, %v1152_v22  ;;  %v327_v33 = vadd.f32 %v1152_v22, %v326_v26 }
  0xf2   :  { %v492_v31 = vsel %vm420_vm14, %v322_v16, %v456_v25  ;;  %v974_v34 = vpop.f32.mrf.mxu0  ;;  %vm418_vm0 = vcmp.gt.f32.partialorder %v314_v28, 0.0  ;;  %v454_v37 = vmul.f32 0.2, %v314_v28  ;;  %v509_v38 = vsel %vm437_vm13, %v391_v15, %v473_v24 }
  0xf3   :  { %v859_v35 = vpack.c.bf16 %v492_v31, %v491_v30  ;;  %v512_v36 = vsel %vm440_vm15, %v402_v23, %v476_v27  ;;  %vm438_vm1 = vcmp.gt.f32.partialorder %v394_v29, 0.0  ;;  %v474_v40 = vmul.f32 0.2, %v394_v29 }
  0xf4   :  { %v909_v39 = vpack.c.bf16 %v512_v36, %v511_v20  ;;  %v329_v41 = vpop.f32.mrf.mxu0  ;;  %v489_v42 = vsel %vm417_vm12, %v311_v2, %v453_v21  ;;  %v490_v43 = vsel %vm418_vm0, %v314_v28, %v454_v37  ;;  %v459_v44 = vmul.f32 0.2, %v335_v32 }
  0xf5   :  { %917 = vst [vmem:[#allocation2 + $0x38] sm:$0xff] %v859_v35   ;;  %v457_v45 = vmul.f32 0.2, %v327_v33  ;;  %v854_v46 = vpack.c.bf16 %v490_v43, %v489_v42  ;;  %v510_v47 = vsel %vm438_vm1, %v394_v29, %v474_v40  ;;  %v338_v48 = vadd.f32 %v974_v34, %v1152_v22 }
  0xf6   :  { %927 = vst [vmem:[#allocation2 + $0x88] sm:$0xff] %v909_v39   ;;  %v330_v49 = vadd.f32 %v1152_v22, %v329_v41  ;;  %v904_v50 = vpack.c.bf16 %v510_v47, %v509_v38  ;;  %vm423_vm2 = vcmp.gt.f32.partialorder %v335_v32, 0.0  ;;  %vm421_vm3 = vcmp.gt.f32.partialorder %v327_v33, 0.0 }
  0xf7   :  { %916 = vst [vmem:[#allocation2 + $0x30] sm:$0xff] %v854_v46   ;;  %vm424_vm4 = vcmp.gt.f32.partialorder %v338_v48, 0.0  ;;  %v460_v51 = vmul.f32 0.2, %v338_v48  ;;  %v495_v53 = vsel %vm423_vm2, %v335_v32, %v459_v44  ;;  %v493_v54 = vsel %vm421_vm3, %v327_v33, %v457_v45 }
  0xf8   :  { %vm422_vm5 = vcmp.gt.f32.partialorder %v330_v49, 0.0  ;;  %v458_v52 = vmul.f32 0.2, %v330_v49  ;;  %926 = vst [vmem:[#allocation2 + $0x80] sm:$0xff] %v904_v50  }
  0xf9   :  { %v496_v55 = vsel %vm424_vm4, %v338_v48, %v460_v51 }
  0xfa   :  { %v494_v56 = vsel %vm422_vm5, %v330_v49, %v458_v52  ;;  %v869_v57 = vpack.c.bf16 %v496_v55, %v495_v53 }
  0xfb   :  { %v864_v58 = vpack.c.bf16 %v494_v56, %v493_v54 }
  0xfc   :  { %919 = vst [vmem:[#allocation2 + $0x48] sm:$0xff] %v869_v57  }
  0xfd   :  { %918 = vst [vmem:[#allocation2 + $0x40] sm:$0xff] %v864_v58  }
  0xfe   :  { %1034 = shalt.err (!%p1031_p4)
}
  0xff   :  { %s1046_s28 = smov 64   ;;  %s1047_s29 = smov 4  }
 0x100   :  { %704 = dma.vmem_to_hbm [thread:$0]  %s699_s2, 2304, %s1201_s3, [#allocation3], %s1046_s28, %s1046_s28, %s1047_s29  }
 0x101   :  { %1043 = dma.done.wait [#allocation3], 2304  }
 0x102   :  { %1044 = vsyncadd [#allocation3], 4294964992 }
 0x103   :  { %708 = vsyncpa [#allocation3], 1 }

</bundles_post_ra>
